<compile_context>
chip_gen: v7x
topology: tpu7x:2x2x1
jax: 0.10.0
libtpu: 0.0.40
codegen_flags: <defaults>
</compile_context>

<pallas_src>
import jax
import jax.numpy as jnp
from jax.experimental import pallas as pl
from jax.experimental.pallas import tpu as pltpu


# ----------------------------- kernels ------------------------------------


def _linear_kernel_f32out(x_ref, w_ref, b_ref, o_ref):
    """y = x @ W + b, accumulating directly in the resident f32 output block."""
    k = pl.program_id(2)

    @pl.when(k == 0)
    def _init():
        o_ref[...] = jnp.zeros_like(o_ref)

    o_ref[...] += jnp.dot(x_ref[...], w_ref[...],
                          preferred_element_type=jnp.float32)

    @pl.when(k == pl.num_programs(2) - 1)
    def _finalize():
        o_ref[...] += b_ref[...]          # (1, tn) broadcast over (tm, tn)


def _linear_kernel_acc(x_ref, w_ref, b_ref, o_ref, acc_ref):
    """y = x @ W + b with an f32 scratch accumulator (non-f32 outputs)."""
    k = pl.program_id(2)

    @pl.when(k == 0)
    def _init():
        acc_ref[...] = jnp.zeros_like(acc_ref)

    acc_ref[...] += jnp.dot(x_ref[...], w_ref[...],
                            preferred_element_type=jnp.float32)

    @pl.when(k == pl.num_programs(2) - 1)
    def _finalize():
        o_ref[...] = (acc_ref[...] +
                      b_ref[...].astype(jnp.float32)).astype(o_ref.dtype)


# ----------------------------- helpers -------------------------------------


def _cdiv(a, b):
    return -(-a // b)


def _round_up(v, m):
    return _cdiv(v, m) * m


def _sublane_multiple(dtype):
    # f32 -> 8, bf16 -> 16, int8/fp8 -> 32 (sub-32-bit dtypes pack sublanes).
    return max(8, 32 // jnp.dtype(dtype).itemsize)


def pad_weight_k(w, tk=512):
    """Zero-pad W's K (reduction) dim to a tile multiple ONCE at init so the
    hot path never copies the weight.  Only K padding is correctness-critical."""
    K, _ = w.shape
    if K <= tk:
        return w
    tk = _round_up(tk, 128)
    Kp = _round_up(K, tk)
    if Kp == K:
        return w
    return jnp.pad(w, ((0, Kp - K), (0, 0)))


# ----------------------------- wrapper -------------------------------------


def noisy_linear(x, w, b, *, noise_stddev=0.1, training=False, key=None,
                 tm=256, tn=512, tk=512, w_pipeline_buffers=None):
    """Pallas forward pass of NoisyLinear.

    x: (B, IN), w: (IN[_padded], OUT), b: (OUT,).  Returns (B, OUT) in x.dtype.
    w may be pre-padded along K with zero rows (see pad_weight_k).
    """
    M, K = x.shape
    Kw, N = w.shape
    assert Kw >= K and b.shape == (N,)
    out_dtype = x.dtype

    # --- training: fuse the gaussian noise into the activation stream ------
    if training:
        if key is None:
            key = jax.random.PRNGKey(0)   # NOTE: deterministic; pass a fresh key per step.
        noise = noise_stddev * jax.random.normal(key, x.shape, jnp.float32)
        # torch adds in fp32; do the same, then cast back to the activation dtype.
        x = (x.astype(jnp.float32) + noise).astype(out_dtype)

    # --- tile selection ------------------------------------------------------
    sm = _sublane_multiple(out_dtype)
    tm = max(sm, min(_round_up(tm, sm), _round_up(M, sm)))
    tn_eff = N if N <= tn else _round_up(tn, 128)           # lane-dense interior tiles
    if Kw <= tk:
        tk_eff, Kp = Kw, Kw
    else:
        tk_eff = _round_up(tk, 128)
        Kp = _round_up(Kw, tk_eff)

    # v7x has 2 TensorCores: keep >= 2 blocks on the (i, j) "parallel" sub-grid
    # when there is enough batch to split (grow M-blocks, never shrink N width).
    if _cdiv(M, tm) * _cdiv(N, tn_eff) == 1 and M >= 2 * sm:
        tm = _round_up(_cdiv(M, 2), sm)

    grid = (_cdiv(M, tm), _cdiv(N, tn_eff), _cdiv(Kp, tk_eff))

    # --- zero-pad ONLY the reduction dim (correctness-critical) --------------
    if Kp != K:
        x = jnp.pad(x, ((0, 0), (0, Kp - K)))
    if Kp != Kw:
        w = jnp.pad(w, ((0, Kp - Kw), (0, 0)))   # avoid per-call: pad_weight_k at init
    b2 = b.reshape(1, N)

    # --- specs ----------------------------------------------------------------
    x_spec = pl.BlockSpec((tm, tk_eff), lambda i, j, k: (i, k))
    w_kwargs = {}
    if w_pipeline_buffers is not None:        # deepen W pipeline if DMA is exposed
        w_kwargs["pipeline_mode"] = pl.Buffered(w_pipeline_buffers)
    w_spec = pl.BlockSpec((tk_eff, tn_eff), lambda i, j, k: (k, j), **w_kwargs)
    b_spec = pl.BlockSpec((1, tn_eff), lambda i, j, k: (0, j))
    o_spec = pl.BlockSpec((tm, tn_eff), lambda i, j, k: (i, j))

    direct_f32 = (jnp.dtype(out_dtype) == jnp.float32)
    kernel = _linear_kernel_f32out if direct_f32 else _linear_kernel_acc
    scratch = [] if direct_f32 else [pltpu.VMEM((tm, tn_eff), jnp.float32)]

    # --- VMEM budget: only raise the scoped limit when the tiles need it -----
    def _isz(a):
        return jnp.dtype(a.dtype).itemsize

    out_isz = jnp.dtype(out_dtype).itemsize
    vmem_bytes = 2 * (tm * tk_eff * _isz(x) + tk_eff * tn_eff * _isz(w)
                      + tm * tn_eff * out_isz + tn_eff * _isz(b2))
    if not direct_f32:
        vmem_bytes += tm * tn_eff * 4
    cp_kwargs = dict(dimension_semantics=("parallel", "parallel", "arbitrary"))
    if vmem_bytes > 12 * 1024 * 1024:
        cp_kwargs["vmem_limit_bytes"] = min(2 * vmem_bytes, 64 * 1024 * 1024)

    cost = pl.CostEstimate(
        flops=2 * M * K * N, transcendentals=0,
        bytes_accessed=int(x.size * _isz(x) + w.size * _isz(w)
                           + b.size * _isz(b) + M * N * out_isz))

    grid_spec = pltpu.PrefetchScalarGridSpec(
        num_scalar_prefetch=0,
        grid=grid,
        in_specs=[x_spec, w_spec, b_spec],
        out_specs=o_spec,
        scratch_shapes=scratch,
    )

    return pl.pallas_call(
        kernel,
        out_shape=jax.ShapeDtypeStruct((M, N), out_dtype),
        grid_spec=grid_spec,
        compiler_params=pltpu.CompilerParams(**cp_kwargs),
        cost_estimate=cost,
    )(x, w, b2)


# ----------------------------- init & demo ---------------------------------


def _init_params(key, input_size, output_size, dtype=jnp.float32):
    # nn.init.xavier_uniform_ on (input_size, output_size); zero bias.
    bound = (6.0 / (input_size + output_size)) ** 0.5
    w = jax.random.uniform(key, (input_size, output_size),
                           dtype=jnp.float32, minval=-bound, maxval=bound)
    b = jnp.zeros((output_size,), dtype=jnp.float32)
    return w.astype(dtype), b


if __name__ == "__main__":
    noise_stddev = 0.1
    root = jax.random.PRNGKey(0)
    kx, kw, kx2, kw2, kx3, kw3 = jax.random.split(root, 6)

    # --- small shape from the original example: x(8,32) @ W(32,128) + b -----
    batch, input_size, output_size = 8, 32, 128
    x = jax.random.normal(kx, (batch, input_size), dtype=jnp.float32)
    w, b = _init_params(kw, input_size, output_size)

    # Inference path: y = x @ w + b
    y = jax.block_until_ready(noisy_linear(x, w, b, training=False))
    y_ref = x @ w + b[None, :]
    assert jnp.allclose(y, y_ref, atol=1e-5, rtol=1e-5), "inference mismatch"

    # Training path: y = (x + noise) @ w + b (noise fused into the x stream)
    key_noise = jax.random.PRNGKey(42)
    y_tr = jax.block_until_ready(
        noisy_linear(x, w, b, noise_stddev=noise_stddev, training=True,
                     key=key_noise))
    noise_ref = noise_stddev * jax.random.normal(key_noise, x.shape, jnp.float32)
    y_tr_ref = (x + noise_ref) @ w + b[None, :]
    assert jnp.allclose(y_tr, y_tr_ref, atol=1e-4, rtol=1e-4), "training mismatch"

    # --- multi-block (i, j) grid + non-128-multiple N, no padding/slice -----
    B2, IN2, OUT2 = 256, 512, 320
    x2 = jax.random.normal(kx2, (B2, IN2), dtype=jnp.float32)
    w2, b2 = _init_params(kw2, IN2, OUT2)
    y2 = jax.block_until_ready(noisy_linear(x2, w2, b2, training=False))
    y2_ref = x2 @ w2 + b2[None, :]
    assert jnp.allclose(y2, y2_ref, atol=1e-3, rtol=1e-3), "tiled mismatch"

    # --- K > tk (zero-padded reduction, pre-padded W) + N > tn --------------
    B3, IN3, OUT3 = 64, 1152, 640
    x3 = jax.random.normal(kx3, (B3, IN3), dtype=jnp.float32)
    w3, b3 = _init_params(kw3, IN3, OUT3)
    w3p = pad_weight_k(w3, tk=512)              # one-time, off the hot path
    y3 = jax.block_until_ready(noisy_linear(x3, w3p, b3, training=False))
    y3_ref = x3 @ w3 + b3[None, :]
    assert jnp.allclose(y3, y3_ref, atol=1e-2, rtol=1e-2), "big-K mismatch"

    # --- bf16 operands (f32 MXU accumulation, scratch-accumulator kernel) ---
    xb = x2.astype(jnp.bfloat16)
    wb = w2.astype(jnp.bfloat16)
    yb = jax.block_until_ready(noisy_linear(xb, wb, b2, training=False))
    yb_ref = xb.astype(jnp.float32) @ wb.astype(jnp.float32) + b2[None, :]
    assert jnp.allclose(yb.astype(jnp.float32), yb_ref, atol=5e-2, rtol=5e-2), \
        "bf16 mismatch"

    print("KERNEL_OK")
</pallas_src>

<mosaic_0001>
module attributes {stable_mosaic.version = 11 : i64} {
  func.func @_linear_kernel_f32out(%arg0: i32, %arg1: i32, %arg2: i32, %arg3: memref<8x32xf32, #tpu.memory_space<vmem>>, %arg4: memref<32x128xf32, #tpu.memory_space<vmem>>, %arg5: memref<1x128xf32, #tpu.memory_space<vmem>>, %arg6: memref<8x128xf32, #tpu.memory_space<vmem>>) attributes {dimension_semantics = [#tpu.dimension_semantics<parallel>, #tpu.dimension_semantics<parallel>, #tpu.dimension_semantics<arbitrary>], iteration_bounds = array<i64: 1, 1, 1>, scalar_prefetch = 0 : i64, scratch_operands = 0 : i64, tpu.core_type = #tpu.core_type<tc>, window_params = [{transform_indices = @transform_0, window_bounds = array<i64: 8, 32>}, {transform_indices = @transform_1, window_bounds = array<i64: 32, 128>}, {transform_indices = @transform_2, window_bounds = array<i64: 1, 128>}, {transform_indices = @transform_3, window_bounds = array<i64: 8, 128>}]} {
    %c0_i32 = arith.constant 0 : i32
    %0 = arith.cmpi eq, %arg2, %c0_i32 : i32
    %1 = arith.extui %0 : i1 to i32
    %c0_i32_0 = arith.constant 0 : i32
    %2 = arith.cmpi ne, %1, %c0_i32_0 : i32
    scf.if %2 {
      %cst_10 = arith.constant 0.000000e+00 : f32
      %12 = vector.broadcast %cst_10 : f32 to vector<8x128xf32>
      %c0_11 = arith.constant 0 : index
      %c0_12 = arith.constant 0 : index
      %13 = vector.load %arg6[%c0_11, %c0_12] : memref<8x128xf32, #tpu.memory_space<vmem>>, vector<8x128xf32>
      tpu.vector_store %arg6[%c0_11, %c0_12], %12 {strides = array<i32>} : memref<8x128xf32, #tpu.memory_space<vmem>>, vector<8x128xf32>,
    } else {
    }
    %c0 = arith.constant 0 : index
    %c0_1 = arith.constant 0 : index
    %3 = vector.load %arg6[%c0, %c0_1] : memref<8x128xf32, #tpu.memory_space<vmem>>, vector<8x128xf32>
    %c0_2 = arith.constant 0 : index
    %c0_3 = arith.constant 0 : index
    %4 = vector.load %arg3[%c0_2, %c0_3] : memref<8x32xf32, #tpu.memory_space<vmem>>, vector<8x32xf32>
    %c0_4 = arith.constant 0 : index
    %c0_5 = arith.constant 0 : index
    %5 = vector.load %arg4[%c0_4, %c0_5] : memref<32x128xf32, #tpu.memory_space<vmem>>, vector<32x128xf32>
    %cst = arith.constant dense<0.000000e+00> : vector<8x128xf32>
    %6 = tpu.matmul %4, %5, %cst {dimension_numbers = #tpu.dot_dimension_numbers<[1], [0], [0], [1], [0, 0, 1, 1], [], []>} : vector<8x32xf32>, vector<32x128xf32>, vector<8x128xf32> -> vector<8x128xf32>
    %7 = arith.addf %3, %6 : vector<8x128xf32>
    %c0_6 = arith.constant 0 : index
    %c0_7 = arith.constant 0 : index
    %8 = vector.load %arg6[%c0_6, %c0_7] : memref<8x128xf32, #tpu.memory_space<vmem>>, vector<8x128xf32>
    tpu.vector_store %arg6[%c0_6, %c0_7], %7 {strides = array<i32>} : memref<8x128xf32, #tpu.memory_space<vmem>>, vector<8x128xf32>,
    %c0_i32_8 = arith.constant 0 : i32
    %9 = arith.cmpi eq, %arg2, %c0_i32_8 : i32
    %10 = arith.extui %9 : i1 to i32
    %c0_i32_9 = arith.constant 0 : i32
    %11 = arith.cmpi ne, %10, %c0_i32_9 : i32
    scf.if %11 {
      %c0_10 = arith.constant 0 : index
      %c0_11 = arith.constant 0 : index
      %12 = vector.load %arg6[%c0_10, %c0_11] : memref<8x128xf32, #tpu.memory_space<vmem>>, vector<8x128xf32>
      %c0_12 = arith.constant 0 : index
      %c0_13 = arith.constant 0 : index
      %13 = vector.load %arg5[%c0_12, %c0_13] : memref<1x128xf32, #tpu.memory_space<vmem>>, vector<1x128xf32>
      %14 = vector.broadcast %13 : vector<1x128xf32> to vector<8x128xf32>
      %15 = arith.addf %12, %14 : vector<8x128xf32>
      %c0_14 = arith.constant 0 : index
      %c0_15 = arith.constant 0 : index
      %16 = vector.load %arg6[%c0_14, %c0_15] : memref<8x128xf32, #tpu.memory_space<vmem>>, vector<8x128xf32>
      tpu.vector_store %arg6[%c0_14, %c0_15], %15 {strides = array<i32>} : memref<8x128xf32, #tpu.memory_space<vmem>>, vector<8x128xf32>,
    } else {
    }
    return
  }
  func.func @transform_0(%arg0: i32, %arg1: i32, %arg2: i32) -> (i32, i32) {
    %c0_i32 = arith.constant 0 : i32
    return %arg0, %arg2 : i32, i32
  }
  func.func @transform_1(%arg0: i32, %arg1: i32, %arg2: i32) -> (i32, i32) {
    %c0_i32 = arith.constant 0 : i32
    return %arg2, %arg1 : i32, i32
  }
  func.func @transform_2(%arg0: i32, %arg1: i32, %arg2: i32) -> (i32, i32) {
    %c0_i32 = arith.constant 0 : i32
    %c0_i32_0 = arith.constant 0 : i32
    return %c0_i32, %arg1 : i32, i32
  }
  func.func @transform_3(%arg0: i32, %arg1: i32, %arg2: i32) -> (i32, i32) {
    %c0_i32 = arith.constant 0 : i32
    return %arg0, %arg1 : i32, i32
  }
}

</mosaic_0001>

<bundles_post_ra>
// kernel: tpu_custom_call.1
= control target key start
LH: loop header
LB: loop body
LE: loop exit
PB: predicated region body
PF: predicated region fallthrough
CT: control target
= control target key end

     0   :  { %8 = vsyncpa [#allocation3], 0  ;;  %s335_s0 = inlined_call_operand.hbm [shape: f32[8,32], index: 0, kind: input, shape index: {}]   ;;  %s336_s1 = inlined_call_operand.hbm [shape: f32[32,128], index: 1, kind: input, shape index: {}]   ;;  %s337_s2 = inlined_call_operand.vmem [shape: f32[1,128], index: 2, kind: input, shape index: {}]   ;;  %s338_s3 = inlined_call_operand.hbm [shape: f32[8,128], index: 3, kind: output, shape index: {}]  }
   0x1   :  { %9 = vsyncpa [#allocation6], 0 }
   0x2   :  { %10 = vsyncpa [#allocation4], 0  ;;  %s261_s12 = smov [#allocation2]   ;;  %s262_s14 = smov [#allocation5]  }
   0x3   :  { %s17_s13 = sshll.u32 %s261_s12, 4  ;;  %s26_s15 = sshll.u32 %s262_s14, 4  ;;  %s18_s13 = int_to_ptr.vmem [resolvable:$true] %s17_s13  ;;  %s289_s15 = int_to_ptr.vmem [resolvable:$true] %s26_s15 }
   0x4   :  { %s189_s18 = scalar_lea.hbm %s335_s0, 128 }
   0x5   :  { %p190_p0 = scmp.ne.s32.totalorder %s335_s0, %s189_s18  ;;  %p193_p1 = scmp.lt.u32.totalorder %s189_s18, %s335_s0 }
   0x7   :  { %p195_p2 = pnand %p193_p1, %p190_p0 }
   0x9   :  { %198 = shalt.err (!%p195_p2)
}
   0xa   :  { %s199_s23 = scalar_lea.vmem %s18_s13, 128  ;;  %p204_p4 = scmp.lt.s32.totalorder %s18_s13, %s18_s13 }
   0xb   :  { %p200_p3 = scmp.ne.s32.totalorder %s18_s13, %s199_s23  ;;  %p205_p5 = scmp.lt.s32.totalorder %s199_s23, %s199_s23 }
   0xd   :  { %p206_p6 = por %p205_p5, %p204_p4 }
   0xf   :  { %p207_p7 = pnand %p206_p6, %p200_p3 }
  0x11   :  { %210 = shalt.err (!%p207_p7)
}
  0x12   :  { %20 = dma.hbm_to_vmem [thread:$0]  %s335_s0, 128, %s18_s13, [#allocation3]  }
  0x13   :  { %s211_s28 = scalar_lea.hbm %s336_s1, 512 }
  0x14   :  { %p212_p8 = scmp.ne.s32.totalorder %s336_s1, %s211_s28  ;;  %p215_p9 = scmp.lt.u32.totalorder %s211_s28, %s336_s1 }
  0x16   :  { %p217_p10 = pnand %p215_p9, %p212_p8 }
  0x18   :  { %220 = shalt.err (!%p217_p10)
}
  0x19   :  { %s221_s6 = scalar_lea.vmem %s289_s15, 512  ;;  %p226_p12 = scmp.lt.s32.totalorder %s289_s15, %s289_s15 }
  0x1a   :  { %p222_p11 = scmp.ne.s32.totalorder %s289_s15, %s221_s6  ;;  %p227_p13 = scmp.lt.s32.totalorder %s221_s6, %s221_s6 }
  0x1c   :  { %p228_p0 = por %p227_p13, %p226_p12 }
  0x1e   :  { %p229_p1 = pnand %p228_p0, %p222_p11 }
  0x20   :  { %232 = shalt.err (!%p229_p1)
}
  0x21   :  { %s263_s0 = smov 128   ;;  %s264_s7 = smov 8  }
  0x22   :  { %32 = dma.hbm_to_vmem [thread:$0]  %s336_s1, 512, %s289_s15, [#allocation6], %s263_s0, %s263_s0, %s264_s7  }
  0x23   :  { %255 = dma.done.wait [#allocation3], 128  }
  0x24   :  { %256 = vsyncadd [#allocation3], 4294967168 }
  0x25   :  { %257 = dma.done.wait [#allocation6], 512  }
  0x26   :  { %258 = vsyncadd [#allocation6], 4294966784  ;;  %v265_v0 = vmov 0.0|0.0   ;;  %vm266_vm0 = vmmov 0   ;;  %v267_v1 = vmov 0.0   ;;  %v48_v2 = vld [vmem:[#allocation5] sm:$0xff] }
  0x27   :  { %175 = vmatprep.subr.bf16.mxu0 %v265_v0  ;;  %172 = vmatprep.mubr.msk.f32.mxu0 %vm266_vm0, %v267_v1  ;;  %v49_v3 = vld [vmem:[#allocation5 + $0x8] sm:$0xff]  ;;  %v50_v4 = vld [vmem:[#allocation5 + $0x10] sm:$0xff]  ;;  %v51_v6 = vld [vmem:[#allocation5 + $0x18] sm:$0xff]  ;;  %vm52_vm1 = vcmask 261120   ;;  %s268_s11 = smov [#allocation7]  }
  0x28   :  { %v176_v5 = vpack.c.bf16 %v49_v3, %v48_v2  ;;  %v179_v7 = vpack.c.bf16 %v51_v6, %v50_v4  ;;  %v47_v8 = vld [vmem:[#allocation2] sm:$0xff]  ;;  %s147_s12 = sshll.u32 %s268_s11, 4  ;;  %s148_s12 = int_to_ptr.vmem [resolvable:$true] %s147_s12 }
  0x29   :  { %v158_v10 = vld [vmem:[%s337_s2] ss:$0 sm:$0xff]  ;;  %s233_s13 = scalar_lea.vmem %s148_s12, 128  ;;  %p238_p3 = scmp.lt.s32.totalorder %s148_s12, %s148_s12 }
  0x2a   :  { %177 = vmatpush3.bf16.msra.mxu0 %v176_v5  ;;  %p234_p2 = scmp.ne.s32.totalorder %s148_s12, %s233_s13  ;;  %p239_p4 = scmp.lt.s32.totalorder %s233_s13, %s233_s13 }
  0x2b   :  { %178 = vmatprep.subr.bf16.mxu0 %v265_v0 }
  0x2c   :  { %p240_p5 = por %p239_p4, %p238_p3 }
  0x2e   :  { %180 = vmatpush3.bf16.msra.mxu0 %v179_v7  ;;  %p241_p6 = pnand %p240_p5, %p234_p2 }
  0x31   :  { %173 = vmatmul.mubr.msk.f32.vlgmr.msra.gmra.mrb[0].mxu0 %vm52_vm1, %v47_v8 }
 0x104   :  { %v122_v9 = vpop.f32.mrb[0].mxu0 }
 0x105   :  { %v174_v11 = vpop.f32.mrb[1].mxu0  ;;  %v139_v12 = vadd.f32 %v158_v10, %v122_v9 }
 0x107   :  { %140 = vst [vmem:[#allocation7] sm:$0xff] %v139_v12 }
 0x108   :  { %244 = shalt.err (!%p241_p6)
}
 0x109   :  { %s245_s16 = scalar_lea.hbm %s338_s3, 128 }
 0x10a   :  { %p246_p7 = scmp.ne.s32.totalorder %s338_s3, %s245_s16  ;;  %p249_p8 = scmp.lt.u32.totalorder %s245_s16, %s338_s3 }
 0x10c   :  { %p251_p9 = pnand %p249_p8, %p246_p7 }
 0x10e   :  { %254 = shalt.err (!%p251_p9)
}
 0x10f   :  { %150 = dma.vmem_to_hbm [thread:$0]  %s148_s12, 128, %s338_s3, [#allocation4]  }
 0x110   :  { %259 = dma.done.wait [#allocation4], 128  }
 0x111   :  { %260 = vsyncadd [#allocation4], 4294967168 }
 0x112   :  { %154 = vsyncpa [#allocation3], 1 }
 0x113   :  { %155 = vsyncpa [#allocation6], 1 }
 0x114   :  { %156 = vsyncpa [#allocation4], 1 }

</bundles_post_ra>
